<compile_context>
chip_gen: v7x
topology: tpu7x:2x2x1
jax: 0.10.0
libtpu: 0.0.40
codegen_flags: <defaults>
</compile_context>

<pallas_src>
import jax
import jax.numpy as jnp
from jax.experimental import pallas as pl
from jax.experimental.pallas import tpu as pltpu


def _visual_embeddings_kernel(x_ref, w_ref, posb_ref, g_ref, beta_ref, o_ref):
    # x_ref:    (tile_s, V)  f32   input features for one (batch, seq-tile)
    # w_ref:    (V, H)       bf16  word_embeddings.weight^T, VMEM-resident
    # posb_ref: (tile_s, H)  f32   position rows + linear bias
    # g_ref:    (1, H)       f32   LayerNorm gamma
    # beta_ref: (1, H)       f32   LayerNorm beta
    # o_ref:    (tile_s, H)        output tile
    x = x_ref[...].astype(jnp.bfloat16)          # in-kernel cast (VPU, under MXU)
    h = jnp.dot(x, w_ref[...], preferred_element_type=jnp.float32)
    h = h + posb_ref[...]                        # pos embedding + linear bias (folded)

    # LayerNorm over hidden axis, eps = 1e-12 (matches PyTorch LayerNorm).
    mean = jnp.mean(h, axis=-1, keepdims=True)
    centered = h - mean
    var = jnp.mean(centered * centered, axis=-1, keepdims=True)
    y = centered * jax.lax.rsqrt(var + 1e-12)
    y = y * g_ref[...] + beta_ref[...]

    # Dropout: identity in eval mode.
    # TODO(synk): training-mode dropout would need pltpu.prng_seed/prng_random_bits.
    o_ref[...] = y.astype(o_ref.dtype)


def visual_embeddings(input_embeddings, w, b, pos_table, gamma, beta):
    """input_embeddings: (B, S, V) f32
       w: (V, H) (nn.Linear weight transposed), b: (H,),
       pos_table: (max_pos, H), gamma/beta: (H,)"""
    B, S, V = input_embeddings.shape
    H = w.shape[1]
    assert pos_table.shape[0] >= S, "position table shorter than sequence"

    # Resident-weight path: bf16 weight must fit comfortably in VMEM.
    # TODO(synk): add a K-tiled fallback (reduction grid axis + f32 accumulator)
    # for configs where V*H*2 bytes does not fit VMEM.
    assert V * H * 2 <= 24 * 1024 * 1024, "weight too large for resident-weight kernel"

    # Fold the linear bias into the (S, H) positional rows (one fewer VPU add and
    # one fewer input stream); NOT replicated over batch.
    posb = pos_table[:S].astype(jnp.float32) + b.astype(jnp.float32)[None, :]   # (S, H)

    # Weight cast once in the wrapper; it is DMA'd into VMEM exactly once.
    w_bf16 = w.astype(jnp.bfloat16)

    g2 = gamma.reshape(1, H).astype(jnp.float32)
    beta2 = beta.reshape(1, H).astype(jnp.float32)

    # Sequence tiling: full-S block for modest S (always layout-legal: equals the
    # array dim), else 256-row blocks (multiple of 8; Pallas handles the ragged
    # last block -- garbage rows are never written back).
    if S <= 512:
        tile_s = S
    else:
        tile_s = 256
    num_s = pl.cdiv(S, tile_s)

    grid_spec = pltpu.PrefetchScalarGridSpec(
        num_scalar_prefetch=0,
        grid=(B, num_s),
        in_specs=[
            pl.BlockSpec((None, tile_s, V), lambda bi, si: (bi, si, 0)),  # x rows
            pl.BlockSpec((V, H), lambda bi, si: (0, 0)),                  # resident weight
            pl.BlockSpec((tile_s, H), lambda bi, si: (si, 0)),            # pos + bias
            pl.BlockSpec((1, H), lambda bi, si: (0, 0)),                  # gamma
            pl.BlockSpec((1, H), lambda bi, si: (0, 0)),                  # beta
        ],
        out_specs=pl.BlockSpec((None, tile_s, H), lambda bi, si: (bi, si, 0)),
    )

    cost = pl.CostEstimate(
        flops=2 * B * S * V * H,
        transcendentals=B * S,                 # one rsqrt per output row
        bytes_accessed=(B * S * V * 4          # f32 input, streamed once
                        + V * H * 2            # bf16 weight, fetched once (resident)
                        + B * S * H * 4        # pos+bias rows (re-fetched per batch)
                        + B * S * H * 4),      # f32 output
    )

    out = pl.pallas_call(
        _visual_embeddings_kernel,
        out_shape=jax.ShapeDtypeStruct((B, S, H), input_embeddings.dtype),
        grid_spec=grid_spec,
        compiler_params=pltpu.CompilerParams(
            dimension_semantics=("parallel", "parallel"),
        ),
        cost_estimate=cost,
    )(input_embeddings, w_bf16, posb, g2, beta2)

    return out


def reference(input_embeddings, w, b, pos_table, gamma, beta):
    B, S, V = input_embeddings.shape
    h = jnp.einsum("bsv,vh->bsh", input_embeddings, w) + b
    h = h + pos_table[:S][None, :, :]
    mean = jnp.mean(h, axis=-1, keepdims=True)
    var = jnp.mean((h - mean) ** 2, axis=-1, keepdims=True)
    y = (h - mean) * jax.lax.rsqrt(var + 1e-12)
    return y * gamma + beta


if __name__ == "__main__":
    # Small config consistent with the module:
    #   vocab_size=128 (input feature dim of the Linear), hidden_size=128,
    #   max_position_embeddings=16, batch=2, seq=8.
    B, S, V, H, MAXPOS = 2, 8, 128, 128, 16

    key = jax.random.PRNGKey(0)
    k_x, k_w, k_b, k_pos, k_g, k_beta = jax.random.split(key, 6)

    x = jax.random.normal(k_x, (B, S, V), dtype=jnp.float32)
    # nn.Linear(vocab_size, hidden_size): weight (H, V); stored transposed (V, H).
    w = jax.random.normal(k_w, (V, H), dtype=jnp.float32) * 0.02
    b = jax.random.normal(k_b, (H,), dtype=jnp.float32) * 0.02
    # nn.Embedding(max_position_embeddings, hidden_size)
    pos_table = jax.random.normal(k_pos, (MAXPOS, H), dtype=jnp.float32) * 0.02
    # LayerNorm affine params
    gamma = jnp.ones((H,), dtype=jnp.float32) + 0.1 * jax.random.normal(k_g, (H,), jnp.float32)
    beta = 0.1 * jax.random.normal(k_beta, (H,), jnp.float32)

    out = visual_embeddings(x, w, b, pos_table, gamma, beta)
    out = jax.block_until_ready(out)

    ref = reference(x, w, b, pos_table, gamma, beta)
    assert out.shape == (B, S, H)
    # bf16 MXU operands (f32 accumulation) => looser tolerance vs pure-f32 reference.
    # NOTE: intentional numerics deviation from the f32 PyTorch Linear.
    assert jnp.allclose(out, ref, atol=2e-2, rtol=2e-2), "mismatch vs reference"

    print("KERNEL_OK")
</pallas_src>

<mosaic_0001>
module attributes {stable_mosaic.version = 11 : i64} {
  func.func @_visual_embeddings_kernel(%arg0: i32, %arg1: i32, %arg2: memref<1x8x128xf32, #tpu.memory_space<vmem>>, %arg3: memref<128x128xbf16, #tpu.memory_space<vmem>>, %arg4: memref<8x128xf32, #tpu.memory_space<vmem>>, %arg5: memref<1x128xf32, #tpu.memory_space<vmem>>, %arg6: memref<1x128xf32, #tpu.memory_space<vmem>>, %arg7: memref<1x8x128xf32, #tpu.memory_space<vmem>>) attributes {dimension_semantics = [#tpu.dimension_semantics<parallel>, #tpu.dimension_semantics<parallel>], iteration_bounds = array<i64: 2, 1>, scalar_prefetch = 0 : i64, scratch_operands = 0 : i64, tpu.core_type = #tpu.core_type<tc>, window_params = [{transform_indices = @transform_0, window_bounds = array<i64: 1, 8, 128>}, {pipeline_mode = #tpu.pipeline_mode<synchronous>, transform_indices = @transform_1, window_bounds = array<i64: 128, 128>}, {transform_indices = @transform_2, window_bounds = array<i64: 8, 128>}, {pipeline_mode = #tpu.pipeline_mode<synchronous>, transform_indices = @transform_3, window_bounds = array<i64: 1, 128>}, {pipeline_mode = #tpu.pipeline_mode<synchronous>, transform_indices = @transform_4, window_bounds = array<i64: 1, 128>}, {transform_indices = @transform_5, window_bounds = array<i64: 1, 8, 128>}]} {
    %c0 = arith.constant 0 : index
    %c0_0 = arith.constant 0 : index
    %c0_1 = arith.constant 0 : index
    %0 = vector.load %arg2[%c0, %c0_0, %c0_1] : memref<1x8x128xf32, #tpu.memory_space<vmem>>, vector<1x8x128xf32>
    %1 = vector.shape_cast %0 : vector<1x8x128xf32> to vector<8x128xf32>
    %2 = arith.truncf %1 : vector<8x128xf32> to vector<8x128xbf16>
    %c0_2 = arith.constant 0 : index
    %c0_3 = arith.constant 0 : index
    %3 = vector.load %arg3[%c0_2, %c0_3] : memref<128x128xbf16, #tpu.memory_space<vmem>>, vector<128x128xbf16>
    %cst = arith.constant dense<0.000000e+00> : vector<8x128xf32>
    %4 = tpu.matmul %2, %3, %cst {dimension_numbers = #tpu.dot_dimension_numbers<[1], [0], [0], [1], [0, 0, 1, 1], [], []>} : vector<8x128xbf16>, vector<128x128xbf16>, vector<8x128xf32> -> vector<8x128xf32>
    %c0_4 = arith.constant 0 : index
    %c0_5 = arith.constant 0 : index
    %5 = vector.load %arg4[%c0_4, %c0_5] : memref<8x128xf32, #tpu.memory_space<vmem>>, vector<8x128xf32>
    %6 = arith.addf %4, %5 : vector<8x128xf32>
    %cst_6 = arith.constant dense<0.000000e+00> : vector<8xf32>
    %7 = vector.multi_reduction <add>, %6, %cst_6 [1] : vector<8x128xf32> to vector<8xf32>
    %8 = vector.shape_cast %7 : vector<8xf32> to vector<8x1xf32>
    %cst_7 = arith.constant 1.280000e+02 : f32
    %9 = vector.broadcast %cst_7 : f32 to vector<8x1xf32>
    %10 = arith.divf %8, %9 : vector<8x1xf32>
    %11 = vector.broadcast %10 : vector<8x1xf32> to vector<8x128xf32>
    %12 = arith.subf %6, %11 : vector<8x128xf32>
    %13 = arith.mulf %12, %12 : vector<8x128xf32>
    %cst_8 = arith.constant dense<0.000000e+00> : vector<8xf32>
    %14 = vector.multi_reduction <add>, %13, %cst_8 [1] : vector<8x128xf32> to vector<8xf32>
    %15 = vector.shape_cast %14 : vector<8xf32> to vector<8x1xf32>
    %cst_9 = arith.constant 1.280000e+02 : f32
    %16 = vector.broadcast %cst_9 : f32 to vector<8x1xf32>
    %17 = arith.divf %15, %16 : vector<8x1xf32>
    %cst_10 = arith.constant 9.99999996E-13 : f32
    %18 = vector.broadcast %cst_10 : f32 to vector<8x1xf32>
    %19 = arith.addf %17, %18 : vector<8x1xf32>
    %20 = math.rsqrt %19 : vector<8x1xf32>
    %21 = vector.broadcast %20 : vector<8x1xf32> to vector<8x128xf32>
    %22 = arith.mulf %12, %21 : vector<8x128xf32>
    %c0_11 = arith.constant 0 : index
    %c0_12 = arith.constant 0 : index
    %23 = vector.load %arg5[%c0_11, %c0_12] : memref<1x128xf32, #tpu.memory_space<vmem>>, vector<1x128xf32>
    %24 = vector.broadcast %23 : vector<1x128xf32> to vector<8x128xf32>
    %25 = arith.mulf %22, %24 : vector<8x128xf32>
    %c0_13 = arith.constant 0 : index
    %c0_14 = arith.constant 0 : index
    %26 = vector.load %arg6[%c0_13, %c0_14] : memref<1x128xf32, #tpu.memory_space<vmem>>, vector<1x128xf32>
    %27 = vector.broadcast %26 : vector<1x128xf32> to vector<8x128xf32>
    %28 = arith.addf %25, %27 : vector<8x128xf32>
    %c0_15 = arith.constant 0 : index
    %c0_16 = arith.constant 0 : index
    %c0_17 = arith.constant 0 : index
    %29 = vector.load %arg7[%c0_15, %c0_16, %c0_17] : memref<1x8x128xf32, #tpu.memory_space<vmem>>, vector<1x8x128xf32>
    %30 = vector.shape_cast %29 : vector<1x8x128xf32> to vector<8x128xf32>
    %31 = vector.shape_cast %28 : vector<8x128xf32> to vector<1x8x128xf32>
    tpu.vector_store %arg7[%c0_15, %c0_16, %c0_17], %31 {strides = array<i32>} : memref<1x8x128xf32, #tpu.memory_space<vmem>>, vector<1x8x128xf32>,
    return
  }
  func.func @transform_0(%arg0: i32, %arg1: i32) -> (i32, i32, i32) {
    %c0_i32 = arith.constant 0 : i32
    %c0_i32_0 = arith.constant 0 : i32
    return %arg0, %arg1, %c0_i32 : i32, i32, i32
  }
  func.func @transform_1(%arg0: i32, %arg1: i32) -> (i32, i32) {
    %c0_i32 = arith.constant 0 : i32
    %c0_i32_0 = arith.constant 0 : i32
    %c0_i32_1 = arith.constant 0 : i32
    return %c0_i32, %c0_i32_0 : i32, i32
  }
  func.func @transform_2(%arg0: i32, %arg1: i32) -> (i32, i32) {
    %c0_i32 = arith.constant 0 : i32
    %c0_i32_0 = arith.constant 0 : i32
    return %arg1, %c0_i32 : i32, i32
  }
  func.func @transform_3(%arg0: i32, %arg1: i32) -> (i32, i32) {
    %c0_i32 = arith.constant 0 : i32
    %c0_i32_0 = arith.constant 0 : i32
    %c0_i32_1 = arith.constant 0 : i32
    return %c0_i32, %c0_i32_0 : i32, i32
  }
  func.func @transform_4(%arg0: i32, %arg1: i32) -> (i32, i32) {
    %c0_i32 = arith.constant 0 : i32
    %c0_i32_0 = arith.constant 0 : i32
    %c0_i32_1 = arith.constant 0 : i32
    return %c0_i32, %c0_i32_0 : i32, i32
  }
  func.func @transform_5(%arg0: i32, %arg1: i32) -> (i32, i32, i32) {
    %c0_i32 = arith.constant 0 : i32
    %c0_i32_0 = arith.constant 0 : i32
    return %arg0, %arg1, %c0_i32 : i32, i32, i32
  }
}

</mosaic_0001>

<bundles_post_ra>
// kernel: tpu_custom_call.1
= control target key start
LH: loop header
LB: loop body
LE: loop exit
PB: predicated region body
PF: predicated region fallthrough
CT: control target
= control target key end

     0   :  { %10 = vsyncpa [#allocation3], 0  ;;  %s1169_s0 = inlined_call_operand.hbm [shape: f32[2,8,128], index: 0, kind: input, shape index: {}]   ;;  %s1170_s1 = inlined_call_operand.hbm [shape: bf16[128,128], index: 1, kind: input, shape index: {}]   ;;  %s1171_s2 = inlined_call_operand.hbm [shape: f32[8,128], index: 2, kind: input, shape index: {}]   ;;  %s1172_s3 = inlined_call_operand.vmem [shape: f32[1,128], index: 3, kind: input, shape index: {}]   ;;  %s1173_s4 = inlined_call_operand.vmem [shape: f32[1,128], index: 4, kind: input, shape index: {}]   ;;  %s1174_s5 = inlined_call_operand.hbm [shape: f32[2,8,128], index: 5, kind: output, shape index: {}]  }
   0x1   :  { %12 = vsyncpa [#allocation3 + $0x1], 0 }
   0x2   :  { %13 = vsyncpa [#allocation6], 0 }
   0x3   :  { %14 = vsyncpa [#allocation4], 0 }
   0x4   :  { %16 = vsyncpa [#allocation4 + $0x1], 0  ;;  %s909_s18 = smov 0   ;;  %s911_s19 = smov 0  }
   0x5   :  { %s913_s20 = smov 0   ;;  %s915_s21 = smov 0  }
   0x6   :  { %s917_s22 = smov 0   ;;  %s919_s23 = smov 0  }
   0x7 LB: > { %s544_s24 = sadd.s32 4294967295, %s869_s23   ;;  %s545_s25 = sadd.s32 4294967294, %s869_s23   ;;  %s869_s23 = sphi %s919_s23, %s22_s23   ;;  %s865_s22 = sphi %s917_s22, %s1196_s22   ;;  %s861_s21 = sphi %s915_s21, %s1195_s21   ;;  %s857_s20 = sphi %s913_s20, %s1194_s20   ;;  %s853_s19 = sphi %s911_s19, %s1193_s19   ;;  %s849_s18 = sphi %s909_s18, %s1192_s18  }
   0x8   : > { %p56_p0 = scmp.ne.s32.totalorder %s853_s19, %s849_s18  ;;  %p943_p1 = scmp.eq.s32.totalorder %s544_s24, 0 }
   0x9   : > { %p947_p2 = scmp.eq.s32.totalorder %s544_s24, 1  ;;  %p177_p3 = scmp.eq.s32.totalorder %s545_s25, 1 }
   0xa   : > { %s1179_s26 = scalar_select %p943_p1, 1, 0 }
   0xb   : > { %p953_p4 = por %p943_p1, %p56_p0  ;;  %p546_p5 = scmp.ge.s32.totalorder %s869_s23, 1 }
   0xc   : > { %p958_p6 = por %p177_p3, %p56_p0  ;;  %p184_p7 = scmp.lt.s32.totalorder %s869_s23, 3 }
   0xd   : > { %s1181_s28 = scalar_select %p953_p4, 1, 0 }
   0xe   : > { %s1182_s29 = scalar_select %p958_p6, 1, 0 }
   0xf   : > { %p963_p8 = pnand %p546_p5, %p184_p7  ;;  %s871_s6 = smov [#allocation5]  }
  0x10   : > { %s196_s7 = sshll.u32 %s871_s6, 4  ;;  %s872_s9 = smov [#allocation7]   ;;  %s967_s7 = int_to_ptr.vmem [resolvable:$true] %s196_s7 }
  0x11   : > { %p612_p9 = pneg %p963_p8  ;;  %s212_s10 = sshll.u32 %s872_s9, 4  ;;  %s978_s10 = int_to_ptr.vmem [resolvable:$true] %s212_s10 }
  0x12   : > { %s697_s13 = scalar_lea.hbm %s1170_s1, 1024 }
  0x13   : > { %p974_p11 = pnand %p612_p9, %p943_p1  ;;  %p698_p12 = scmp.ne.s32.totalorder %s1170_s1, %s697_s13 }
  0x14   : > { %p704_p5 = scmp.lt.u32.totalorder %s697_s13, %s1170_s1 }
  0x15   : > { %p699_p13 = pneg %p974_p11 }
  0x17   : > { %p700_p0 = pnand %p699_p13, %p698_p12 }
  0x19   : > { %p701_p3 = pneg %p700_p0 }
  0x1b   : > { %p706_p7 = pnand %p704_p5, %p701_p3 }
  0x1d   : > { %709 = shalt.err (!%p706_p7)
}
  0x1e   : > { %s710_s24 = scalar_lea.vmem %s967_s7, 1024  ;;  %p718_p1 = scmp.lt.s32.totalorder %s967_s7, %s967_s7 }
  0x1f   : > { %p711_p9 = scmp.ne.s32.totalorder %s967_s7, %s710_s24  ;;  %p719_p12 = scmp.lt.s32.totalorder %s710_s24, %s710_s24 }
  0x21   : > { %p713_p10 = pnand %p711_p9, %p699_p13  ;;  %p720_p0 = por %p719_p12, %p718_p1 }
  0x23   : > { %p714_p6 = pneg %p713_p10 }
  0x25   : > { %p721_p4 = pnand %p720_p0, %p714_p6 }
  0x27   : > { %724 = shalt.err (!%p721_p4)
}
  0x28   : > { %s873_s25 = smov 64   ;;  %s874_s6 = smov 4  }
  0x29   : > { %615 = dma.hbm_to_vmem [thread:$0]  (!%p974_p11), %s1170_s1, 1024, %s967_s7, [#allocation6], %s873_s25, %s873_s25, %s874_s6  }
  0x2a   : > { %s725_s14 = scalar_lea.hbm %s1171_s2, 128 }
  0x2b   : > { %p726_p1 = scmp.ne.s32.totalorder %s1171_s2, %s725_s14  ;;  %p732_p10 = scmp.lt.u32.totalorder %s725_s14, %s1171_s2 }
  0x2d   : > { %p728_p4 = pnand %p726_p1, %p699_p13 }
  0x2f   : > { %p729_p6 = pneg %p728_p4 }
  0x31   : > { %p734_p3 = pnand %p732_p10, %p729_p6 }
  0x33   : > { %737 = shalt.err (!%p734_p3)
}
  0x34   : > { %s738_s7 = scalar_lea.vmem %s978_s10, 128  ;;  %p746_p12 = scmp.lt.s32.totalorder %s978_s10, %s978_s10 }
  0x35   : > { %p739_p5 = scmp.ne.s32.totalorder %s978_s10, %s738_s7  ;;  %p747_p0 = scmp.lt.s32.totalorder %s738_s7, %s738_s7 }
  0x37   : > { %p741_p7 = pnand %p739_p5, %p699_p13  ;;  %p748_p1 = por %p747_p0, %p746_p12 }
  0x39   : > { %p742_p9 = pneg %p741_p7 }
  0x3b   : > { %p749_p4 = pnand %p748_p1, %p742_p9 }
  0x3d   : > { %752 = shalt.err (!%p749_p4)
}
  0x3e   : > { %618 = dma.hbm_to_vmem [thread:$0]  (!%p974_p11), %s1171_s2, 128, %s978_s10, [#allocation6]  }
  0x3f   : > { %s34_s9 = sadd.s32 1, %s865_s22  ;;  %s43_s11 = sadd.s32 1, %s857_s20 }
  0x40   : > { %p36_p13 = scmp.ge.s32.totalorder %s34_s9, 2  ;;  %p50_p6 = scmp.ne.s32.totalorder %s857_s20, %s853_s19 }
  0x41   : > { %p51_p10 = scmp.eq.s32.totalorder %s869_s23, 0  ;;  %p629_p3 = scmp.lt.s32.totalorder %s869_s23, 2 }
  0x42   : > { %s1198_s9 = smov (%p36_p13, %s34_s9), 0  ;;  %p1042_p7 = por %p947_p2, %p50_p6 }
  0x43   : > { %p52_p5 = por %p51_p10, %p50_p6  ;;  %s38_s12 = ssub.s32 %s865_s22, %s1198_s9 }
  0x44   : > { %s1185_s8 = scalar_select %p1042_p7, 1, 0 }
  0x45   : > { %s229_s13 = sand.u32 1, %s857_s20   ;;  %p41_p9 = scmp.eq.s32.totalorder %s38_s12, 0 }
  0x46   : > { %s550_s10 = sshll.u32 %s229_s13, 3  ;;  %s551_s14 = sshll.u32 %s865_s22, 7 }
  0x47   : > { %s1051_s15 = scalar_select %p41_p9, %s857_s20, %s43_s11  }
  0x48   : > { %s1056_s24 = scalar_lea.hbm %s1169_s0, %s551_s14  ;;  %s233_s27 = scalar_lea.vmem [#allocation2], %s550_s10 }
  0x49   : > { %s241_s7 = sshll.u32 %s233_s27, 4  ;;  %p1060_p2 = pnand %p629_p3, %p52_p5  ;;  %s1064_s7 = int_to_ptr.vmem [resolvable:$true] %s241_s7 }
  0x4a   : > { %s230_s6 = scalar_lea.sflag [#allocation3], %s229_s13  ;;  %s753_s11 = scalar_lea.hbm %s1056_s24, 128 }
  0x4b   : > { %p754_p11 = scmp.ne.s32.totalorder %s1056_s24, %s753_s11  ;;  %p755_p12 = pneg %p1060_p2 }
  0x4c   : > { %s758_s14 = scalar_lea.hbm %s1169_s0, 256  ;;  %p759_p4 = scmp.lt.u32.totalorder %s1056_s24, %s1169_s0 }
  0x4d   : > { %p756_p0 = pnand %p755_p12, %p754_p11  ;;  %p760_p13 = scmp.lt.u32.totalorder %s758_s14, %s753_s11 }
  0x4e   : > { %p762_p10 = scmp.lt.u32.totalorder %s753_s11, %s1056_s24 }
  0x4f   : > { %p757_p1 = pneg %p756_p0  ;;  %p761_p6 = por %p760_p13, %p759_p4 }
  0x51   : > { %p763_p3 = por %p762_p10, %p761_p6 }
  0x53   : > { %p764_p5 = pnand %p763_p3, %p757_p1 }
  0x55   : > { %767 = shalt.err (!%p764_p5)
}
  0x56   : > { %s768_s13 = scalar_lea.vmem %s1064_s7, 128  ;;  %s875_s27 = smov [#allocation2]  }
  0x57   : > { %p769_p9 = scmp.ne.s32.totalorder %s1064_s7, %s768_s13  ;;  %s773_s12 = sshll.u32 %s875_s27, 4  ;;  %s774_s12 = int_to_ptr.vmem [resolvable:$false] %s773_s12 }
  0x58   : > { %s775_s10 = scalar_lea.vmem %s774_s12, 256  ;;  %p776_p7 = scmp.lt.s32.totalorder %s1064_s7, %s774_s12 }
  0x59   : > { %p771_p11 = pnand %p769_p9, %p755_p12  ;;  %p777_p4 = scmp.lt.s32.totalorder %s775_s10, %s768_s13 }
  0x5b   : > { %p772_p0 = pneg %p771_p11  ;;  %p778_p13 = por %p777_p4, %p776_p7 }
  0x5d   : > { %p779_p6 = pnand %p778_p13, %p772_p0 }
  0x5f   : > { %782 = shalt.err (!%p779_p6)
}
  0x60   : > { %622 = dma.hbm_to_vmem [thread:$0]  (!%p1060_p2), %s1056_s24, 128, %s1064_s7, %s230_s6  }
  0x61   : > { %250 = sbr.rel (%p963_p8) target bundleno = 680 (0x2a8), region = 40  ;;  %s1094_s11 = sand.u32 (!%p963_p8), 1, %s853_s19  }
  0x62   : > { %s553_s14 = sshll.u32 (!%p963_p8), %s1094_s11, 3  ;;  %s253_s16 = scalar_lea.sflag (!%p963_p8), [#allocation3], %s1094_s11 }
  0x63   : > { %s256_s17 = scalar_lea.vmem (!%p963_p8), [#allocation2], %s553_s14  ;;  %p1187_p7 = scmp.ne.s32.totalorder (!%p963_p8), %s1181_s28, 0 }
  0x68   : > { %836 = dma.done.wait (%p1187_p7), %s253_s16, 128  }
  0x69   : > { %838 = vsyncadd (%p1187_p7), %s253_s16, 4294967168  ;;  %p1188_p2 = scmp.ne.s32.totalorder %s1179_s26, 0 }
  0x6b   : > { %840 = dma.done.wait (%p1188_p2), [#allocation6], 1152  }
  0x6c   : > { %842 = vsyncadd (%p1188_p2), [#allocation6], 4294966144  ;;  %v876_v0 = vmov 0.0   ;;  %vm877_vm0 = vmmov 0   ;;  %v687_v1 = vld [vmem:[#allocation5] sm:$0xff]   ;;  %v688_v2 = vld [vmem:[#allocation5 + $0x8] sm:$0xff]  }
  0x6d   : > { %580 = vmatprep.subr.bf16.mxu0 %v876_v0  ;;  %596 = vmatprep.mubr.msk.bf16.mxu0 %vm877_vm0, %v876_v0  ;;  %v689_v3 = vld [vmem:[#allocation5 + $0x10] sm:$0xff]   ;;  %v690_v4 = vld [vmem:[#allocation5 + $0x18] sm:$0xff]   ;;  %v691_v5 = vld [vmem:[#allocation5 + $0x20] sm:$0xff]   ;;  %s568_s7 = sshll.u32 %s861_s21, 7  ;;  %s290_s25 = scalar_lea.vmem [#allocation8], %s553_s14 }
  0x6e   : > { %581 = vmatpush3.bf16.msra.mxu0 %v687_v1  ;;  %v692_v6 = vld [vmem:[#allocation5 + $0x28] sm:$0xff]   ;;  %v693_v7 = vld [vmem:[#allocation5 + $0x30] sm:$0xff]   ;;  %v694_v8 = vld [vmem:[#allocation5 + $0x38] sm:$0xff]   ;;  %s443_s6 = sshll.u32 %s290_s25, 4  ;;  %s1120_s12 = scalar_lea.hbm %s1174_s5, %s568_s7  ;;  %s1122_s6 = int_to_ptr.vmem [resolvable:$true] %s443_s6 }
  0x6f   : > { %582 = vmatprep.subr.bf16.mxu0 %v876_v0  ;;  %v292_v9 = vld [vmem:[%s256_s17] sm:$0xff]  ;;  %v310_v11 = vld [vmem:[#allocation7] sm:$0xff]  ;;  %s429_s10 = scalar_lea.sflag [#allocation4], %s1094_s11  ;;  %s783_s16 = scalar_lea.vmem %s1122_s6, 128 }
  0x70   : > { %v293_v10 = vpack.c.bf16 %v292_v9, %v292_v9  ;;  %v565_v25 = vld [vmem:[%s1172_s3] ss:$0 sm:$0xff]  ;;  %p784_p8 = scmp.ne.s32.totalorder %s1122_s6, %s783_s16  ;;  %p1189_p12 = scmp.ne.s32.totalorder %s1185_s8, 0 }
  0x71   : > { %v566_v27 = vld [vmem:[%s1173_s4] ss:$0 sm:$0xff]  ;;  %s878_s21 = smov [#allocation8]  }
  0x72   : > { %583 = vmatpush3.bf16.msra.mxu0 %v688_v2  ;;  %p785_p1 = pnand %p784_p8, %p1189_p12  ;;  %s787_s14 = sshll.u32 %s878_s21, 4  ;;  %s788_s14 = int_to_ptr.vmem [resolvable:$false] %s787_s14 }
  0x73   : > { %584 = vmatprep.subr.bf16.mxu0 %v876_v0  ;;  %s789_s17 = scalar_lea.vmem %s788_s14, 256  ;;  %p790_p3 = scmp.lt.s32.totalorder %s1122_s6, %s788_s14 }
  0x74   : > { %p786_p10 = pneg %p785_p1  ;;  %p791_p5 = scmp.lt.s32.totalorder %s789_s17, %s783_s16 }
  0x76   : > { %585 = vmatpush3.bf16.msra.mxu0 %v689_v3  ;;  %p792_p9 = por %p791_p5, %p790_p3 }
  0x77   : > { %586 = vmatprep.subr.bf16.mxu0 %v876_v0 }
  0x78   : > { %p793_p11 = pnand %p792_p9, %p786_p10 }
  0x7a   : > { %587 = vmatpush3.bf16.msra.mxu0 %v690_v4 }
  0x7b   : > { %588 = vmatprep.subr.bf16.mxu0 %v876_v0 }
  0x7e   : > { %589 = vmatpush3.bf16.msra.mxu0 %v691_v5 }
  0x7f   : > { %590 = vmatprep.subr.bf16.mxu0 %v876_v0 }
  0x82   : > { %591 = vmatpush3.bf16.msra.mxu0 %v692_v6 }
  0x83   : > { %592 = vmatprep.subr.bf16.mxu0 %v876_v0 }
  0x86   : > { %593 = vmatpush3.bf16.msra.mxu0 %v693_v7 }
  0x87   : > { %594 = vmatprep.subr.bf16.mxu0 %v876_v0 }
  0x8a   : > { %595 = vmatpush3.bf16.msra.mxu0 %v694_v8 }
  0x8d   : > { %597 = vmatmul.mubr.bf16.vlgmr.msra.gmra.mrb[0].mxu0 %v293_v10 }
 0x160   : > { %v393_v12 = vpop.f32.mrb[0].mxu0 }
 0x161   : > { %v394_v13 = vadd.f32 %v393_v12, %v310_v11  ;;  %v598_v14 = vpop.f32.mrb[1].mxu0 }
 0x162   : > { %v396_v15 = vpop.f32.mrb[2].mxu0 }
 0x163   : > { %399 = vadd.xlane.f32.xlu0 %v394_v13  ;;  %v599_v16 = vpop.f32.mrb[3].mxu0 }
 0x1f0   : > { %v400_v17 = vpop.xlane.xlu0 %399 }
 0x1f1   : > { %v402_v18 = vmul.f32 0.0078125, %v400_v17 }
 0x1f3   : > { %v403_v19 = vsub.f32 %v394_v13, %v402_v18 }
 0x1f5   : > { %v404_v20 = vmul.f32 %v403_v19, %v403_v19 }
 0x1f7   : > { %405 = vadd.xlane.f32.xlu0 %v404_v20 }
 0x284   : > { %v406_v21 = vpop.xlane.xlu0 %405 }
 0x285   : > { %v407_v22 = vmul.f32 0.0078125, %v406_v21 }
 0x287   : > { %v408_v23 = vadd.f32 1e-12, %v407_v22 }
 0x289   : > { %695 = vrsqrt.f32 %v408_v23 }
 0x293   : > { %v696_v24 = vpop.eup %695 }
 0x294   : > { %v410_v26 = vmul.f32 %v696_v24, %v403_v19 }
 0x296   : > { %v418_v28 = vmul.f32 %v565_v25, %v410_v26 }
 0x298   : > { %v426_v29 = vadd.f32 %v566_v27, %v418_v28 }
 0x29a   : > { %427 = vst [vmem:[%s290_s25] sm:$0xff] %v426_v29 }
 0x29b   : > { %796 = shalt.err (!%p793_p11)
}
 0x29c   : > { %s797_s11 = scalar_lea.hbm %s1120_s12, 128  ;;  %s801_s30 = scalar_lea.hbm %s1174_s5, 256 }
 0x29d   : > { %p798_p0 = scmp.ne.s32.totalorder %s1120_s12, %s797_s11  ;;  %p802_p6 = scmp.lt.u32.totalorder %s1120_s12, %s1174_s5 }
 0x29e   : > { %p803_p7 = scmp.lt.u32.totalorder %s801_s30, %s797_s11  ;;  %p805_p8 = scmp.lt.u32.totalorder %s797_s11, %s1120_s12 }
 0x29f   : > { %p799_p4 = pnand %p798_p0, %p1189_p12 }
 0x2a0   : > { %p804_p2 = por %p803_p7, %p802_p6 }
 0x2a1   : > { %p800_p13 = pneg %p799_p4 }
 0x2a2   : > { %p806_p1 = por %p805_p8, %p804_p2 }
 0x2a4   : > { %p807_p10 = pnand %p806_p1, %p800_p13 }
 0x2a6   : > { %810 = shalt.err (!%p807_p10)
}
 0x2a7   : > { %610 = dma.vmem_to_hbm [thread:$0]  (%p1189_p12), %s1122_s6, 128, %s1120_s12, %s429_s10  }
 0x2a8 PF: > { %s455_s25 = sand.u32 1, %s849_s18   ;;  %p1190_p3 = scmp.ne.s32.totalorder %s1182_s29, 0 }
 0x2a9   : > { %p1191_p5 = scmp.ge.s32.totalorder %s869_s23, 2  ;;  %s456_s13 = scalar_lea.sflag [#allocation4], %s455_s25 }
 0x2ab   : > { %p624_p9 = pnand %p1191_p5, %p1190_p3 }
 0x2ad   : > { %844 = dma.done.wait (!%p624_p9), %s456_s13, 128  }
 0x2ae   : > { %846 = vsyncadd (!%p624_p9), %s456_s13, 4294967168  ;;  %s22_s23 = sadd.s32 1, %s869_s23   ;;  %s1192_s18 = smov %s853_s19 }
 0x2af   : > { %p19_p11 = scmp.ge.s32.totalorder %s22_s23, 4   ;;  %s1193_s19 = smov %s857_s20 }
 0x2b0   : > { %s1194_s20 = smov %s1051_s15  ;;  %s1195_s21 = smov %s865_s22 }
 0x2b1   : > { %s1196_s22 = smov %s1198_s9  ;;  %21 = sbr.rel (!%p19_p11) target bundleno = 7 (0x7), region = 94 }
 0x2b8   :  { %461 = vsyncpa [#allocation3], 1 }
 0x2b9   :  { %463 = vsyncpa [#allocation3 + $0x1], 1 }
 0x2ba   :  { %464 = vsyncpa [#allocation6], 1 }
 0x2bb   :  { %465 = vsyncpa [#allocation4], 1 }
 0x2bc   :  { %467 = vsyncpa [#allocation4 + $0x1], 1 }

</bundles_post_ra>
